<compile_context>
chip_gen: v7x
topology: tpu7x:2x2x1
jax: 0.10.0
libtpu: 0.0.40
codegen_flags: <defaults>
</compile_context>

<pallas_src>
import math

import jax
import jax.numpy as jnp
from jax.experimental import pallas as pl
from jax.experimental.pallas import tpu as pltpu


def _round_up(x, m):
    return ((x + m - 1) // m) * m


def _vmem_capacity_bytes():
    """Per-core VMEM capacity; conservative 64 MiB fallback (v7x) if unknown."""
    try:
        return int(pltpu.get_tpu_info().vmem_capacity_bytes)
    except Exception:
        return 64 << 20


def _dim_semantics(num_tiles):
    """CORE_PARALLEL on v7x (2 TCs) so the batch loop spans both cores."""
    try:
        kind = jax.devices()[0].device_kind.lower()
    except Exception:
        kind = ""
    if num_tiles >= 2 and "v7" in kind:
        return (pltpu.CORE_PARALLEL,)
    return ("parallel",)


def _kernel(z_ref, w1_ref, b1_ref, w2_ref, b2_ref, w3_ref, b3_ref,
            tgt_ref, mean_ref, std_ref, dist_ref, yhat0_ref):
    # ---- decoder q_YlZ: 2-hidden-layer MLP; bf16 operands, f32 MXU accumulation ----
    h1 = jnp.dot(z_ref[...], w1_ref[...], preferred_element_type=jnp.float32)
    h1 = jnp.maximum(h1 + b1_ref[...], 0.0)
    h2 = jnp.dot(h1.astype(jnp.bfloat16), w2_ref[...],
                 preferred_element_type=jnp.float32)
    h2 = jnp.maximum(h2 + b2_ref[...], 0.0)
    logits = jnp.dot(h2.astype(jnp.bfloat16), w3_ref[...],
                     preferred_element_type=jnp.float32)
    y_hat = jax.nn.sigmoid(logits + b3_ref[...])                 # f32 epilogue

    # ---- UnNormalizer: single FMA against resident (1, D) mean/std rows ----
    y = tgt_ref[...].astype(jnp.float32) * std_ref[...] + mean_ref[...]

    # ---- elementwise MSE summed over all non-batch dims ('b ... -> b', sum) ----
    diff = y_hat - y
    dist_ref[...] = jnp.sum(diff * diff, axis=-1)[None, :]       # lane-dense (1, TB)

    # Only Y_hat[0] (tile 0, row 0) is consumed downstream; emit one row per tile.
    yhat0_ref[...] = y_hat[:1]


def direct_distortion_forward(z_hat, aux_target, params, mean_c, std_c, *,
                              batch_tile=None):
    """z_hat: [B, z_dim] f32, aux_target: [B, C, H, W] f32 (normalized, colored)."""
    B, z_dim = z_hat.shape
    _, C, H, W = aux_target.shape
    D = C * H * W
    HW = H * W

    w1, b1, w2, b2, w3, b3 = params
    Hid = w1.shape[1]

    vmem_cap = _vmem_capacity_bytes()
    if batch_tile is None:
        batch_tile = 512 if vmem_cap <= (64 << 20) else 1024

    if B <= batch_tile:
        TB = B                                   # one full-extent block, no padding
    else:
        TB = max((batch_tile // 8) * 8, 8)       # sublane-aligned tile
    num_tiles = -(-B // TB)

    # ---- glue: flatten target (NCHW row-major) to bf16, lane-pad z's K dim ----
    zk = _round_up(z_dim, 128)
    z_flat = z_hat.astype(jnp.bfloat16)
    w1_in = w1
    if zk != z_dim:
        z_flat = jnp.zeros((B, zk), jnp.bfloat16).at[:, :z_dim].set(z_flat)
        w1_in = jnp.zeros((zk, Hid), w1.dtype).at[:z_dim].set(w1)
    tgt_flat = aux_target.reshape(B, D).astype(jnp.bfloat16)

    w1b = w1_in.astype(jnp.bfloat16)
    w2b = w2.astype(jnp.bfloat16)
    w3b = w3.astype(jnp.bfloat16)
    b1r = b1.reshape(1, Hid).astype(jnp.float32)
    b2r = b2.reshape(1, Hid).astype(jnp.float32)
    b3r = b3.reshape(1, D).astype(jnp.float32)

    # Precomputed per-lane un-normalization constants (channel c -> lanes [c*HW, (c+1)*HW)).
    mean_row = jnp.repeat(mean_c.astype(jnp.float32), HW).reshape(1, D)
    std_row = jnp.repeat(std_c.astype(jnp.float32), HW).reshape(1, D)

    # ---- VMEM budget: DMA'd blocks + resident weights + in-kernel f32 scratch ----
    bf16, f32 = 2, 4
    est = (2 * TB * zk * bf16                               # z tiles (double-buffered)
           + 2 * TB * D * bf16                              # target tiles
           + 2 * ((zk * Hid + Hid * Hid + Hid * D) * bf16   # weights
                  + (2 * Hid + D) * f32                     # biases
                  + 2 * D * f32)                            # mean/std rows
           + 2 * (TB + D) * f32                             # outputs
           + 4 * TB * D * f32                               # y_hat / y / diff / sq
           + 3 * TB * Hid * f32)                            # hidden activations
    ceiling = max(32 << 20, min(vmem_cap - (16 << 20), 100 << 20))
    vmem_limit = int(min(max(est + (4 << 20), 32 << 20), ceiling))

    resident = lambda i: (0, 0)
    tiled = lambda i: (i, 0)
    # TODO(synk): on v7x, single-buffer the resident weight blocks via
    # pipeline_mode=pl.Buffered(1) once validated; omitted here for portability.

    dist_tiles, yhat0_tiles = pl.pallas_call(
        _kernel,
        grid=(num_tiles,),
        in_specs=[
            pl.BlockSpec((TB, zk), tiled),          # z_hat (bf16, lane-padded K)
            pl.BlockSpec((zk, Hid), resident),      # w1
            pl.BlockSpec((1, Hid), resident),       # b1
            pl.BlockSpec((Hid, Hid), resident),     # w2
            pl.BlockSpec((1, Hid), resident),       # b2
            pl.BlockSpec((Hid, D), resident),       # w3
            pl.BlockSpec((1, D), resident),         # b3
            pl.BlockSpec((TB, D), tiled),           # aux_target (flattened, bf16)
            pl.BlockSpec((1, D), resident),         # mean_row (f32)
            pl.BlockSpec((1, D), resident),         # std_row  (f32)
        ],
        out_specs=(
            pl.BlockSpec((1, TB), tiled),           # per-sample distortion, lane-dense
            pl.BlockSpec((1, D), tiled),            # Y_hat row 0 of each tile
        ),
        out_shape=(
            jax.ShapeDtypeStruct((num_tiles, TB), jnp.float32),
            jax.ShapeDtypeStruct((num_tiles, D), jnp.float32),
        ),
        compiler_params=pltpu.CompilerParams(
            dimension_semantics=_dim_semantics(num_tiles),
            vmem_limit_bytes=vmem_limit,
        ),
    )(z_flat, w1b, b1r, w2b, b2r, w3b, b3r, tgt_flat, mean_row, std_row)

    neg_log_q_ylz = dist_tiles.reshape(num_tiles * TB)[:B]         # [B]
    logs = dict(H_q_TlZ=jnp.mean(neg_log_q_ylz) / math.log(2))     # BASE_LOG = 2

    # other['Y'] = unnormalized target row 0: a tiny affine, done in plain JAX.
    y0 = (aux_target[0].astype(jnp.float32) * std_c[:, None, None]
          + mean_c[:, None, None])
    other = dict(
        Y_hat=yhat0_tiles[0].reshape(C, H, W),
        Y=y0,
    )
    return neg_log_q_ylz, logs, other


def init_params(key, z_dim, hidden, out_dim):
    """Deterministic synthetic init for the MLP decoder (Kaiming-like scaling)."""
    k1, k2, k3 = jax.random.split(key, 3)
    w1 = jax.random.normal(k1, (z_dim, hidden), jnp.float32) * math.sqrt(2.0 / z_dim)
    b1 = jnp.zeros((hidden,), jnp.float32)
    w2 = jax.random.normal(k2, (hidden, hidden), jnp.float32) * math.sqrt(2.0 / hidden)
    b2 = jnp.zeros((hidden,), jnp.float32)
    w3 = jax.random.normal(k3, (hidden, out_dim), jnp.float32) * math.sqrt(2.0 / hidden)
    b3 = jnp.zeros((out_dim,), jnp.float32)
    return (w1, b1, w2, b2, w3, b3)


if __name__ == "__main__":
    B, z_dim, hidden = 2, 32, 128
    C, Him, Wim = 3, 16, 16          # colored image target -> is_colored_img == True
    D = C * Him * Wim

    key = jax.random.PRNGKey(0)
    kz, kt, kp = jax.random.split(key, 3)
    z_hat = jax.random.normal(kz, (B, z_dim), jnp.float32)
    aux_target = jax.random.normal(kt, (B, C, Him, Wim), jnp.float32)  # "normalized" images

    params = init_params(kp, z_dim, hidden, D)

    # CIFAR10-style normalization stats (UnNormalizer)
    mean_c = jnp.array([0.4914, 0.4822, 0.4465], jnp.float32)
    std_c = jnp.array([0.2470, 0.2435, 0.2616], jnp.float32)

    neg_log, logs, other = direct_distortion_forward(z_hat, aux_target, params,
                                                     mean_c, std_c)
    jax.block_until_ready(neg_log)
    jax.block_until_ready(logs["H_q_TlZ"])
    jax.block_until_ready(other["Y_hat"])
    jax.block_until_ready(other["Y"])

    assert neg_log.shape == (B,)
    assert other["Y_hat"].shape == (C, Him, Wim)
    assert other["Y"].shape == (C, Him, Wim)
    assert bool(jnp.isfinite(neg_log).all())
    print("KERNEL_OK")
</pallas_src>

<mosaic_0001>
module attributes {stable_mosaic.version = 11 : i64} {
  func.func @_kernel(%arg0: i32, %arg1: memref<2x128xbf16, #tpu.memory_space<vmem>>, %arg2: memref<128x128xbf16, #tpu.memory_space<vmem>>, %arg3: memref<1x128xf32, #tpu.memory_space<vmem>>, %arg4: memref<128x128xbf16, #tpu.memory_space<vmem>>, %arg5: memref<1x128xf32, #tpu.memory_space<vmem>>, %arg6: memref<128x768xbf16, #tpu.memory_space<vmem>>, %arg7: memref<1x768xf32, #tpu.memory_space<vmem>>, %arg8: memref<2x768xbf16, #tpu.memory_space<vmem>>, %arg9: memref<1x768xf32, #tpu.memory_space<vmem>>, %arg10: memref<1x768xf32, #tpu.memory_space<vmem>>, %arg11: memref<1x2xf32, #tpu.memory_space<vmem>>, %arg12: memref<1x768xf32, #tpu.memory_space<vmem>>) attributes {dimension_semantics = [#tpu.dimension_semantics<parallel>], iteration_bounds = array<i64: 1>, scalar_prefetch = 0 : i64, scratch_operands = 0 : i64, tpu.core_type = #tpu.core_type<tc>, window_params = [{transform_indices = @transform_0, window_bounds = array<i64: 2, 128>}, {pipeline_mode = #tpu.pipeline_mode<synchronous>, transform_indices = @transform_1, window_bounds = array<i64: 128, 128>}, {pipeline_mode = #tpu.pipeline_mode<synchronous>, transform_indices = @transform_2, window_bounds = array<i64: 1, 128>}, {pipeline_mode = #tpu.pipeline_mode<synchronous>, transform_indices = @transform_3, window_bounds = array<i64: 128, 128>}, {pipeline_mode = #tpu.pipeline_mode<synchronous>, transform_indices = @transform_4, window_bounds = array<i64: 1, 128>}, {pipeline_mode = #tpu.pipeline_mode<synchronous>, transform_indices = @transform_5, window_bounds = array<i64: 128, 768>}, {pipeline_mode = #tpu.pipeline_mode<synchronous>, transform_indices = @transform_6, window_bounds = array<i64: 1, 768>}, {transform_indices = @transform_7, window_bounds = array<i64: 2, 768>}, {pipeline_mode = #tpu.pipeline_mode<synchronous>, transform_indices = @transform_8, window_bounds = array<i64: 1, 768>}, {pipeline_mode = #tpu.pipeline_mode<synchronous>, transform_indices = @transform_9, window_bounds = array<i64: 1, 768>}, {transform_indices = @transform_10, window_bounds = array<i64: 1, 2>}, {transform_indices = @transform_11, window_bounds = array<i64: 1, 768>}]} {
    %c0 = arith.constant 0 : index
    %c0_0 = arith.constant 0 : index
    %0 = vector.load %arg1[%c0, %c0_0] : memref<2x128xbf16, #tpu.memory_space<vmem>>, vector<2x128xbf16>
    %c0_1 = arith.constant 0 : index
    %c0_2 = arith.constant 0 : index
    %1 = vector.load %arg2[%c0_1, %c0_2] : memref<128x128xbf16, #tpu.memory_space<vmem>>, vector<128x128xbf16>
    %cst = arith.constant dense<0.000000e+00> : vector<2x128xf32>
    %2 = tpu.matmul %0, %1, %cst {dimension_numbers = #tpu.dot_dimension_numbers<[1], [0], [0], [1], [0, 0, 1, 1], [], []>} : vector<2x128xbf16>, vector<128x128xbf16>, vector<2x128xf32> -> vector<2x128xf32>
    %c0_3 = arith.constant 0 : index
    %c0_4 = arith.constant 0 : index
    %3 = vector.load %arg3[%c0_3, %c0_4] : memref<1x128xf32, #tpu.memory_space<vmem>>, vector<1x128xf32>
    %4 = vector.broadcast %3 : vector<1x128xf32> to vector<2x128xf32>
    %5 = arith.addf %2, %4 : vector<2x128xf32>
    %cst_5 = arith.constant 0.000000e+00 : f32
    %6 = vector.broadcast %cst_5 : f32 to vector<2x128xf32>
    %7 = arith.maximumf %5, %6 : vector<2x128xf32>
    %8 = arith.truncf %7 : vector<2x128xf32> to vector<2x128xbf16>
    %c0_6 = arith.constant 0 : index
    %c0_7 = arith.constant 0 : index
    %9 = vector.load %arg4[%c0_6, %c0_7] : memref<128x128xbf16, #tpu.memory_space<vmem>>, vector<128x128xbf16>
    %cst_8 = arith.constant dense<0.000000e+00> : vector<2x128xf32>
    %10 = tpu.matmul %8, %9, %cst_8 {dimension_numbers = #tpu.dot_dimension_numbers<[1], [0], [0], [1], [0, 0, 1, 1], [], []>} : vector<2x128xbf16>, vector<128x128xbf16>, vector<2x128xf32> -> vector<2x128xf32>
    %c0_9 = arith.constant 0 : index
    %c0_10 = arith.constant 0 : index
    %11 = vector.load %arg5[%c0_9, %c0_10] : memref<1x128xf32, #tpu.memory_space<vmem>>, vector<1x128xf32>
    %12 = vector.broadcast %11 : vector<1x128xf32> to vector<2x128xf32>
    %13 = arith.addf %10, %12 : vector<2x128xf32>
    %cst_11 = arith.constant 0.000000e+00 : f32
    %14 = vector.broadcast %cst_11 : f32 to vector<2x128xf32>
    %15 = arith.maximumf %13, %14 : vector<2x128xf32>
    %16 = arith.truncf %15 : vector<2x128xf32> to vector<2x128xbf16>
    %c0_12 = arith.constant 0 : index
    %c0_13 = arith.constant 0 : index
    %17 = vector.load %arg6[%c0_12, %c0_13] : memref<128x768xbf16, #tpu.memory_space<vmem>>, vector<128x768xbf16>
    %cst_14 = arith.constant dense<0.000000e+00> : vector<2x768xf32>
    %18 = tpu.matmul %16, %17, %cst_14 {dimension_numbers = #tpu.dot_dimension_numbers<[1], [0], [0], [1], [0, 0, 1, 1], [], []>} : vector<2x128xbf16>, vector<128x768xbf16>, vector<2x768xf32> -> vector<2x768xf32>
    %c0_15 = arith.constant 0 : index
    %c0_16 = arith.constant 0 : index
    %19 = vector.load %arg7[%c0_15, %c0_16] : memref<1x768xf32, #tpu.memory_space<vmem>>, vector<1x768xf32>
    %20 = vector.broadcast %19 : vector<1x768xf32> to vector<2x768xf32>
    %21 = arith.addf %18, %20 : vector<2x768xf32>
    %22 = arith.negf %21 : vector<2x768xf32>
    %23 = math.exp %22 : vector<2x768xf32>
    %cst_17 = arith.constant 1.000000e+00 : f32
    %24 = vector.broadcast %cst_17 : f32 to vector<2x768xf32>
    %25 = arith.addf %24, %23 : vector<2x768xf32>
    %26 = arith.divf %24, %25 : vector<2x768xf32>
    %c0_18 = arith.constant 0 : index
    %c0_19 = arith.constant 0 : index
    %27 = vector.load %arg8[%c0_18, %c0_19] : memref<2x768xbf16, #tpu.memory_space<vmem>>, vector<2x768xbf16>
    %28 = arith.extf %27 : vector<2x768xbf16> to vector<2x768xf32>
    %c0_20 = arith.constant 0 : index
    %c0_21 = arith.constant 0 : index
    %29 = vector.load %arg10[%c0_20, %c0_21] : memref<1x768xf32, #tpu.memory_space<vmem>>, vector<1x768xf32>
    %30 = vector.broadcast %29 : vector<1x768xf32> to vector<2x768xf32>
    %31 = arith.mulf %28, %30 : vector<2x768xf32>
    %c0_22 = arith.constant 0 : index
    %c0_23 = arith.constant 0 : index
    %32 = vector.load %arg9[%c0_22, %c0_23] : memref<1x768xf32, #tpu.memory_space<vmem>>, vector<1x768xf32>
    %33 = vector.broadcast %32 : vector<1x768xf32> to vector<2x768xf32>
    %34 = arith.addf %31, %33 : vector<2x768xf32>
    %35 = arith.subf %26, %34 : vector<2x768xf32>
    %36 = arith.mulf %35, %35 : vector<2x768xf32>
    %cst_24 = arith.constant dense<0.000000e+00> : vector<2xf32>
    %37 = vector.multi_reduction <add>, %36, %cst_24 [1] : vector<2x768xf32> to vector<2xf32>
    %38 = vector.shape_cast %37 : vector<2xf32> to vector<1x2xf32>
    %c0_25 = arith.constant 0 : index
    %c0_26 = arith.constant 0 : index
    %39 = vector.load %arg11[%c0_25, %c0_26] : memref<1x2xf32, #tpu.memory_space<vmem>>, vector<1x2xf32>
    tpu.vector_store %arg11[%c0_25, %c0_26], %38 {strides = array<i32>} : memref<1x2xf32, #tpu.memory_space<vmem>>, vector<1x2xf32>,
    %40 = vector.extract_strided_slice %26 {offsets = [0, 0], sizes = [1, 768], strides = [1, 1]} : vector<2x768xf32> to vector<1x768xf32>
    %c0_27 = arith.constant 0 : index
    %c0_28 = arith.constant 0 : index
    %41 = vector.load %arg12[%c0_27, %c0_28] : memref<1x768xf32, #tpu.memory_space<vmem>>, vector<1x768xf32>
    tpu.vector_store %arg12[%c0_27, %c0_28], %40 {strides = array<i32>} : memref<1x768xf32, #tpu.memory_space<vmem>>, vector<1x768xf32>,
    return
  }
  func.func @transform_0(%arg0: i32) -> (i32, i32) {
    %c0_i32 = arith.constant 0 : i32
    %c0_i32_0 = arith.constant 0 : i32
    return %arg0, %c0_i32 : i32, i32
  }
  func.func @transform_1(%arg0: i32) -> (i32, i32) {
    %c0_i32 = arith.constant 0 : i32
    %c0_i32_0 = arith.constant 0 : i32
    %c0_i32_1 = arith.constant 0 : i32
    return %c0_i32, %c0_i32_0 : i32, i32
  }
  func.func @transform_2(%arg0: i32) -> (i32, i32) {
    %c0_i32 = arith.constant 0 : i32
    %c0_i32_0 = arith.constant 0 : i32
    %c0_i32_1 = arith.constant 0 : i32
    return %c0_i32, %c0_i32_0 : i32, i32
  }
  func.func @transform_3(%arg0: i32) -> (i32, i32) {
    %c0_i32 = arith.constant 0 : i32
    %c0_i32_0 = arith.constant 0 : i32
    %c0_i32_1 = arith.constant 0 : i32
    return %c0_i32, %c0_i32_0 : i32, i32
  }
  func.func @transform_4(%arg0: i32) -> (i32, i32) {
    %c0_i32 = arith.constant 0 : i32
    %c0_i32_0 = arith.constant 0 : i32
    %c0_i32_1 = arith.constant 0 : i32
    return %c0_i32, %c0_i32_0 : i32, i32
  }
  func.func @transform_5(%arg0: i32) -> (i32, i32) {
    %c0_i32 = arith.constant 0 : i32
    %c0_i32_0 = arith.constant 0 : i32
    %c0_i32_1 = arith.constant 0 : i32
    return %c0_i32, %c0_i32_0 : i32, i32
  }
  func.func @transform_6(%arg0: i32) -> (i32, i32) {
    %c0_i32 = arith.constant 0 : i32
    %c0_i32_0 = arith.constant 0 : i32
    %c0_i32_1 = arith.constant 0 : i32
    return %c0_i32, %c0_i32_0 : i32, i32
  }
  func.func @transform_7(%arg0: i32) -> (i32, i32) {
    %c0_i32 = arith.constant 0 : i32
    %c0_i32_0 = arith.constant 0 : i32
    return %arg0, %c0_i32 : i32, i32
  }
  func.func @transform_8(%arg0: i32) -> (i32, i32) {
    %c0_i32 = arith.constant 0 : i32
    %c0_i32_0 = arith.constant 0 : i32
    %c0_i32_1 = arith.constant 0 : i32
    return %c0_i32, %c0_i32_0 : i32, i32
  }
  func.func @transform_9(%arg0: i32) -> (i32, i32) {
    %c0_i32 = arith.constant 0 : i32
    %c0_i32_0 = arith.constant 0 : i32
    %c0_i32_1 = arith.constant 0 : i32
    return %c0_i32, %c0_i32_0 : i32, i32
  }
  func.func @transform_10(%arg0: i32) -> (i32, i32) {
    %c0_i32 = arith.constant 0 : i32
    %c0_i32_0 = arith.constant 0 : i32
    return %arg0, %c0_i32 : i32, i32
  }
  func.func @transform_11(%arg0: i32) -> (i32, i32) {
    %c0_i32 = arith.constant 0 : i32
    %c0_i32_0 = arith.constant 0 : i32
    return %arg0, %c0_i32 : i32, i32
  }
}

</mosaic_0001>

<bundles_post_ra>
// kernel: tpu_custom_call.1
= control target key start
LH: loop header
LB: loop body
LE: loop exit
PB: predicated region body
PF: predicated region fallthrough
CT: control target
= control target key end

     0   :  { %17 = vsyncpa [#allocation3], 0  ;;  %s1786_s0 = inlined_call_operand.hbm [shape: bf16[2,128], index: 0, kind: input, shape index: {}]   ;;  %s1787_s1 = inlined_call_operand.hbm [shape: bf16[128,128], index: 1, kind: input, shape index: {}]   ;;  %s1788_s2 = inlined_call_operand.hbm [shape: f32[1,128], index: 2, kind: input, shape index: {}]   ;;  %s1789_s3 = inlined_call_operand.hbm [shape: bf16[128,128], index: 3, kind: input, shape index: {}]   ;;  %s1790_s4 = inlined_call_operand.hbm [shape: f32[1,128], index: 4, kind: input, shape index: {}]   ;;  %s1791_s5 = inlined_call_operand.hbm [shape: bf16[128,768], index: 5, kind: input, shape index: {}]   ;;  %s1792_s6 = inlined_call_operand.vmem [shape: f32[1,768], index: 6, kind: input, shape index: {}]   ;;  %s1793_s7 = inlined_call_operand.vmem [shape: bf16[2,768], index: 7, kind: input, shape index: {}]   ;;  %s1794_s8 = inlined_call_operand.vmem [shape: f32[1,768], index: 8, kind: input, shape index: {}]   ;;  %s1795_s9 = inlined_call_operand.vmem [shape: f32[1,768], index: 9, kind: input, shape index: {}]   ;;  %s1796_s10 = inlined_call_operand.hbm [shape: f32[1,2], index: 10, kind: output, shape index: {0}]   ;;  %s1797_s11 = inlined_call_operand.hbm [shape: f32[1,768], index: 11, kind: output, shape index: {1}]  }
   0x1   :  { %18 = vsyncpa [#allocation6], 0 }
   0x2   :  { %19 = vsyncpa [#allocation9], 0 }
   0x3   :  { %20 = vsyncpa [#allocation12], 0 }
   0x4   :  { %21 = vsyncpa [#allocation4], 0 }
   0x5   :  { %22 = vsyncpa [#allocation15], 0  ;;  %s1535_s17 = smov [#allocation5]   ;;  %s1347_s21 = scalar_lea.hbm %s1787_s1, 1024 }
   0x6   :  { %s38_s18 = sshll.u32 %s1535_s17, 4  ;;  %p1348_p0 = scmp.ne.s32.totalorder %s1787_s1, %s1347_s21  ;;  %s39_s18 = int_to_ptr.vmem [resolvable:$true] %s38_s18 }
   0x7   :  { %p1351_p1 = scmp.lt.u32.totalorder %s1347_s21, %s1787_s1 }
   0x9   :  { %p1353_p2 = pnand %p1351_p1, %p1348_p0 }
   0xb   :  { %1356 = shalt.err (!%p1353_p2)
}
   0xc   :  { %s1357_s26 = scalar_lea.vmem %s39_s18, 1024  ;;  %p1362_p4 = scmp.lt.s32.totalorder %s39_s18, %s39_s18 }
   0xd   :  { %p1358_p3 = scmp.ne.s32.totalorder %s39_s18, %s1357_s26  ;;  %p1363_p5 = scmp.lt.s32.totalorder %s1357_s26, %s1357_s26 }
   0xf   :  { %p1364_p6 = por %p1363_p5, %p1362_p4 }
  0x11   :  { %p1365_p7 = pnand %p1364_p6, %p1358_p3 }
  0x13   :  { %1368 = shalt.err (!%p1365_p7)
}
  0x14   :  { %s1536_s27 = smov 64   ;;  %s1537_s28 = smov 4  }
  0x15   :  { %44 = dma.hbm_to_vmem [thread:$0]  %s1787_s1, 1024, %s39_s18, [#allocation6], %s1536_s27, %s1536_s27, %s1537_s28  }
  0x16   :  { %s1538_s12 = smov [#allocation8]   ;;  %s1539_s14 = smov [#allocation2]  }
  0x17   :  { %s60_s13 = sshll.u32 %s1538_s12, 4  ;;  %s29_s15 = sshll.u32 %s1539_s14, 4  ;;  %s61_s13 = int_to_ptr.vmem [resolvable:$true] %s60_s13  ;;  %s30_s15 = int_to_ptr.vmem [resolvable:$true] %s29_s15 }
  0x18   :  { %s1369_s19 = scalar_lea.hbm %s1789_s3, 1024 }
  0x19   :  { %p1370_p8 = scmp.ne.s32.totalorder %s1789_s3, %s1369_s19  ;;  %p1373_p9 = scmp.lt.u32.totalorder %s1369_s19, %s1789_s3 }
  0x1b   :  { %p1375_p10 = pnand %p1373_p9, %p1370_p8 }
  0x1d   :  { %1378 = shalt.err (!%p1375_p10)
}
  0x1e   :  { %s1379_s1 = scalar_lea.vmem %s61_s13, 1024  ;;  %p1384_p12 = scmp.lt.s32.totalorder %s61_s13, %s61_s13 }
  0x1f   :  { %p1380_p11 = scmp.ne.s32.totalorder %s61_s13, %s1379_s1  ;;  %p1385_p13 = scmp.lt.s32.totalorder %s1379_s1, %s1379_s1 }
  0x21   :  { %p1386_p0 = por %p1385_p13, %p1384_p12 }
  0x23   :  { %p1387_p1 = pnand %p1386_p0, %p1380_p11 }
  0x25   :  { %1390 = shalt.err (!%p1387_p1)
}
  0x26   :  { %66 = dma.hbm_to_vmem [thread:$0]  %s1789_s3, 1024, %s61_s13, [#allocation9], %s1536_s27, %s1536_s27, %s1537_s28  }
  0x27   :  { %s1391_s29 = scalar_lea.hbm %s1786_s0, 16 }
  0x28   :  { %p1392_p2 = scmp.ne.s32.totalorder %s1786_s0, %s1391_s29  ;;  %p1395_p3 = scmp.lt.u32.totalorder %s1391_s29, %s1786_s0 }
  0x2a   :  { %p1397_p4 = pnand %p1395_p3, %p1392_p2 }
  0x2c   :  { %1400 = shalt.err (!%p1397_p4)
}
  0x2d   :  { %s1401_s17 = scalar_lea.vmem %s30_s15, 16  ;;  %s1405_s19 = scalar_lea.vmem %s30_s15, 32 }
  0x2e   :  { %p1402_p5 = scmp.ne.s32.totalorder %s30_s15, %s1401_s17  ;;  %p1406_p6 = scmp.lt.s32.totalorder %s30_s15, %s30_s15 }
  0x2f   :  { %p1407_p7 = scmp.lt.s32.totalorder %s1405_s19, %s1401_s17 }
  0x31   :  { %p1408_p8 = por %p1407_p7, %p1406_p6 }
  0x33   :  { %p1409_p9 = pnand %p1408_p8, %p1402_p5 }
  0x35   :  { %1412 = shalt.err (!%p1409_p9)
}
  0x36   :  { %32 = dma.hbm_to_vmem [thread:$0]  %s1786_s0, 16, %s30_s15, [#allocation3]  }
  0x37   :  { %s1540_s28 = smov [#allocation7]   ;;  %s1541_s20 = smov [#allocation10]  }
  0x38   :  { %s51_s13 = sshll.u32 %s1540_s28, 4  ;;  %s73_s21 = sshll.u32 %s1541_s20, 4  ;;  %s52_s13 = int_to_ptr.vmem [resolvable:$true] %s51_s13  ;;  %s74_s21 = int_to_ptr.vmem [resolvable:$true] %s73_s21 }
  0x39   :  { %s1413_s1 = scalar_lea.hbm %s1788_s2, 16 }
  0x3a   :  { %p1414_p10 = scmp.ne.s32.totalorder %s1788_s2, %s1413_s1  ;;  %p1417_p11 = scmp.lt.u32.totalorder %s1413_s1, %s1788_s2 }
  0x3c   :  { %p1419_p12 = pnand %p1417_p11, %p1414_p10 }
  0x3e   :  { %1422 = shalt.err (!%p1419_p12)
}
  0x3f   :  { %s1423_s0 = scalar_lea.vmem %s52_s13, 16  ;;  %s1427_s15 = scalar_lea.vmem %s52_s13, 32 }
  0x40   :  { %p1424_p13 = scmp.ne.s32.totalorder %s52_s13, %s1423_s0  ;;  %p1428_p0 = scmp.lt.s32.totalorder %s52_s13, %s52_s13 }
  0x41   :  { %p1429_p1 = scmp.lt.s32.totalorder %s1427_s15, %s1423_s0 }
  0x43   :  { %p1430_p2 = por %p1429_p1, %p1428_p0 }
  0x45   :  { %p1431_p3 = pnand %p1430_p2, %p1424_p13 }
  0x47   :  { %1434 = shalt.err (!%p1431_p3)
}
  0x48   :  { %54 = dma.hbm_to_vmem [thread:$0]  %s1788_s2, 16, %s52_s13, [#allocation6]  }
  0x49   :  { %s1435_s16 = scalar_lea.hbm %s1790_s4, 16 }
  0x4a   :  { %p1436_p4 = scmp.ne.s32.totalorder %s1790_s4, %s1435_s16  ;;  %p1439_p5 = scmp.lt.u32.totalorder %s1435_s16, %s1790_s4 }
  0x4c   :  { %p1441_p6 = pnand %p1439_p5, %p1436_p4 }
  0x4e   :  { %1444 = shalt.err (!%p1441_p6)
}
  0x4f   :  { %s1445_s28 = scalar_lea.vmem %s74_s21, 16  ;;  %s1449_s20 = scalar_lea.vmem %s74_s21, 32 }
  0x50   :  { %p1446_p7 = scmp.ne.s32.totalorder %s74_s21, %s1445_s28  ;;  %p1450_p8 = scmp.lt.s32.totalorder %s74_s21, %s74_s21 }
  0x51   :  { %p1451_p9 = scmp.lt.s32.totalorder %s1449_s20, %s1445_s28 }
  0x53   :  { %p1452_p10 = por %p1451_p9, %p1450_p8 }
  0x55   :  { %p1453_p11 = pnand %p1452_p10, %p1446_p7 }
  0x57   :  { %1456 = shalt.err (!%p1453_p11)
}
  0x58   :  { %76 = dma.hbm_to_vmem [thread:$0]  %s1790_s4, 16, %s74_s21, [#allocation9]  }
  0x59   :  { %s1542_s22 = smov [#allocation11]   ;;  %s1457_s24 = scalar_lea.hbm %s1791_s5, 6144 }
  0x5a   :  { %s82_s23 = sshll.u32 %s1542_s22, 4  ;;  %p1458_p12 = scmp.ne.s32.totalorder %s1791_s5, %s1457_s24  ;;  %s83_s23 = int_to_ptr.vmem [resolvable:$true] %s82_s23 }
  0x5b   :  { %p1461_p13 = scmp.lt.u32.totalorder %s1457_s24, %s1791_s5 }
  0x5d   :  { %p1463_p0 = pnand %p1461_p13, %p1458_p12 }
  0x5f   :  { %1466 = shalt.err (!%p1463_p0)
}
  0x60   :  { %s1467_s29 = scalar_lea.vmem %s83_s23, 6144  ;;  %p1472_p2 = scmp.lt.s32.totalorder %s83_s23, %s83_s23 }
  0x61   :  { %p1468_p1 = scmp.ne.s32.totalorder %s83_s23, %s1467_s29  ;;  %p1473_p3 = scmp.lt.s32.totalorder %s1467_s29, %s1467_s29 }
  0x63   :  { %p1474_p4 = por %p1473_p3, %p1472_p2 }
  0x65   :  { %p1475_p5 = pnand %p1474_p4, %p1468_p1 }
  0x67   :  { %1478 = shalt.err (!%p1475_p5)
}
  0x68   :  { %s1543_s4 = smov 384   ;;  %s1544_s21 = smov 24  }
  0x69   :  { %88 = dma.hbm_to_vmem [thread:$0]  %s1791_s5, 6144, %s83_s23, [#allocation12], %s1543_s4, %s1543_s4, %s1544_s21  }
  0x6a   :  { %1523 = dma.done.wait [#allocation3], 16  }
  0x6b   :  { %1524 = vsyncadd [#allocation3], 4294967280 }
  0x6c   :  { %1525 = dma.done.wait [#allocation6], 1040  }
  0x6d   :  { %1526 = vsyncadd [#allocation6], 4294966256 }
  0x6e   :  { %1527 = dma.done.wait [#allocation9], 1040  }
  0x6f   :  { %1528 = vsyncadd [#allocation9], 4294966256 }
  0x70   :  { %1529 = dma.done.wait [#allocation12], 6144  }
  0x71   :  { %1530 = vsyncadd [#allocation12], 4294961152  ;;  %v1545_v0 = vmov 0.0   ;;  %vm1546_vm0 = vmmov 0   ;;  %v1235_v1 = vld [vmem:[#allocation5] sm:$0xff]   ;;  %v1236_v2 = vld [vmem:[#allocation5 + $0x8] sm:$0xff]  }
  0x72   :  { %1178 = vmatprep.subr.bf16.mxu0 %v1545_v0  ;;  %1194 = vmatprep.mubr.msk.bf16.mxu0 %vm1546_vm0, %v1545_v0  ;;  %v1237_v3 = vld [vmem:[#allocation5 + $0x10] sm:$0xff]   ;;  %v1243_v4 = vld [vmem:[#allocation8] sm:$0xff]   ;;  %v1238_v5 = vld [vmem:[#allocation5 + $0x18] sm:$0xff]   ;;  %v1547_v59 = vmov 0   ;;  %vm980_vm1 = vcmask 1041408  }
  0x73   :  { %1198 = vmatprep.subr.bf16.mxu1 %v1545_v0  ;;  %1214 = vmatprep.mubr.msk.bf16.mxu1 %vm1546_vm0, %v1545_v0  ;;  %v1244_v6 = vld [vmem:[#allocation8 + $0x8] sm:$0xff]   ;;  %v1239_v7 = vld [vmem:[#allocation5 + $0x20] sm:$0xff]   ;;  %v1245_v8 = vld [vmem:[#allocation8 + $0x10] sm:$0xff]  }
  0x74   :  { %1179 = vmatpush3.bf16.msra.mxu0 %v1235_v1  ;;  %1199 = vmatpush3.bf16.msra.mxu1 %v1243_v4  ;;  %v1240_v9 = vld [vmem:[#allocation5 + $0x28] sm:$0xff]   ;;  %v1246_v10 = vld [vmem:[#allocation8 + $0x18] sm:$0xff]   ;;  %v1241_v11 = vld [vmem:[#allocation5 + $0x30] sm:$0xff]  }
  0x75   :  { %1180 = vmatprep.subr.bf16.mxu0 %v1545_v0  ;;  %1200 = vmatprep.subr.bf16.mxu1 %v1545_v0  ;;  %v1247_v12 = vld [vmem:[#allocation8 + $0x20] sm:$0xff]   ;;  %v1242_v13 = vld [vmem:[#allocation5 + $0x38] sm:$0xff]   ;;  %v1248_v14 = vld [vmem:[#allocation8 + $0x28] sm:$0xff]  }
  0x76   :  { %v116_v15 = vld [vmem:[#allocation2] sm:$0x1]  ;;  %v1249_v16 = vld [vmem:[#allocation8 + $0x30] sm:$0xff]   ;;  %v1253_v19 = vld [vmem:[#allocation11 + $0x4] ss:$24 sps:$4 sm:$0xff]  }
  0x77   :  { %v1250_v17 = vld [vmem:[#allocation8 + $0x38] sm:$0xff]   ;;  %v1256_v20 = vld [vmem:[#allocation11 + $0xc] ss:$24 sps:$4 sm:$0xff]   ;;  %v1257_v22 = vld [vmem:[#allocation11 + $0x30] ss:$24 sps:$4 sm:$0xff]  }
  0x78   :  { %1181 = vmatpush3.bf16.msra.mxu0 %v1236_v2  ;;  %1201 = vmatpush3.bf16.msra.mxu1 %v1244_v6  ;;  %v1251_v18 = vld [vmem:[#allocation11] ss:$24 sps:$4 sm:$0xff]   ;;  %v1259_v21 = vld [vmem:[#allocation11 + $0x34] ss:$24 sps:$4 sm:$0xff]   ;;  %v1265_v23 = vld [vmem:[#allocation11 + $0x64] ss:$24 sps:$4 sm:$0xff]  }
  0x79   :  { %1182 = vmatprep.subr.bf16.mxu0 %v1545_v0  ;;  %1202 = vmatprep.subr.bf16.mxu1 %v1545_v0  ;;  %v1263_v24 = vld [vmem:[#allocation11 + $0x60] ss:$24 sps:$4 sm:$0xff]   ;;  %v1271_v25 = vld [vmem:[#allocation11 + $0x94] ss:$24 sps:$4 sm:$0xff]   ;;  %v1269_v26 = vld [vmem:[#allocation11 + $0x90] ss:$24 sps:$4 sm:$0xff]  }
  0x7a   :  { %v1277_v27 = vld [vmem:[#allocation11 + $0xc4] ss:$24 sps:$4 sm:$0xff]   ;;  %v1275_v28 = vld [vmem:[#allocation11 + $0xc0] ss:$24 sps:$4 sm:$0xff]   ;;  %v1283_v29 = vld [vmem:[#allocation11 + $0xf4] ss:$24 sps:$4 sm:$0xff]  }
  0x7b   :  { %v1281_v30 = vld [vmem:[#allocation11 + $0xf0] ss:$24 sps:$4 sm:$0xff]   ;;  %v1289_v31 = vld [vmem:[#allocation11 + $0x124] ss:$24 sps:$4 sm:$0xff]   ;;  %v1287_v32 = vld [vmem:[#allocation11 + $0x120] ss:$24 sps:$4 sm:$0xff]  }
  0x7c   :  { %1183 = vmatpush3.bf16.msra.mxu0 %v1237_v3  ;;  %1203 = vmatpush3.bf16.msra.mxu1 %v1245_v8  ;;  %v1088_v33 = vld [vmem:[#allocation7] ss:$0 sm:$0xff]  ;;  %v1254_v40 = vld [vmem:[#allocation11 + $0x8] ss:$24 sps:$4 sm:$0xff]   ;;  %v1260_v43 = vld [vmem:[#allocation11 + $0x38] ss:$24 sps:$4 sm:$0xff]  }
  0x7d   :  { %1184 = vmatprep.subr.bf16.mxu0 %v1545_v0  ;;  %1204 = vmatprep.subr.bf16.mxu1 %v1545_v0  ;;  %v1262_v42 = vld [vmem:[#allocation11 + $0x3c] ss:$24 sps:$4 sm:$0xff]   ;;  %v1268_v44 = vld [vmem:[#allocation11 + $0x6c] ss:$24 sps:$4 sm:$0xff]   ;;  %v1266_v45 = vld [vmem:[#allocation11 + $0x68] ss:$24 sps:$4 sm:$0xff]  }
  0x7e   :  { %v1274_v46 = vld [vmem:[#allocation11 + $0x9c] ss:$24 sps:$4 sm:$0xff]   ;;  %v1272_v47 = vld [vmem:[#allocation11 + $0x98] ss:$24 sps:$4 sm:$0xff]   ;;  %v1280_v48 = vld [vmem:[#allocation11 + $0xcc] ss:$24 sps:$4 sm:$0xff]  }
  0x7f   :  { %v1278_v49 = vld [vmem:[#allocation11 + $0xc8] ss:$24 sps:$4 sm:$0xff]   ;;  %v1286_v50 = vld [vmem:[#allocation11 + $0xfc] ss:$24 sps:$4 sm:$0xff]   ;;  %v1284_v51 = vld [vmem:[#allocation11 + $0xf8] ss:$24 sps:$4 sm:$0xff]  }
  0x80   :  { %1185 = vmatpush3.bf16.msra.mxu0 %v1238_v5  ;;  %1205 = vmatpush3.bf16.msra.mxu1 %v1246_v10  ;;  %v1292_v52 = vld [vmem:[#allocation11 + $0x12c] ss:$24 sps:$4 sm:$0xff]   ;;  %v1290_v53 = vld [vmem:[#allocation11 + $0x128] ss:$24 sps:$4 sm:$0xff]   ;;  %v1298_v56 = vld [vmem:[#allocation11 + $0x15c] ss:$24 sps:$4 sm:$0xff]  }
  0x81   :  { %1186 = vmatprep.subr.bf16.mxu0 %v1545_v0  ;;  %1206 = vmatprep.subr.bf16.mxu1 %v1545_v0  ;;  %v1295_v54 = vld [vmem:[#allocation11 + $0x154] ss:$24 sps:$4 sm:$0xff]   ;;  %v1293_v55 = vld [vmem:[#allocation11 + $0x150] ss:$24 sps:$4 sm:$0xff]   ;;  %v1097_v60 = vld [vmem:[#allocation10] ss:$0 sm:$0xff] }
  0x82   :  { %v1296_v57 = vld [vmem:[#allocation11 + $0x158] ss:$24 sps:$4 sm:$0xff]   ;;  %v1301_v58 = vld [vmem:[#allocation11 + $0x14] ss:$24 sps:$4 sm:$0xff]   ;;  %v1304_v5 = vld [vmem:[#allocation11 + $0x44] ss:$24 sps:$4 sm:$0xff]  }
  0x83   :  { %v1299_v3 = vld [vmem:[#allocation11 + $0x10] ss:$24 sps:$4 sm:$0xff]   ;;  %v1302_v6 = vld [vmem:[#allocation11 + $0x40] ss:$24 sps:$4 sm:$0xff]  }
  0x84   :  { %1187 = vmatpush3.bf16.msra.mxu0 %v1239_v7  ;;  %1207 = vmatpush3.bf16.msra.mxu1 %v1247_v12  ;;  %v1307_v7 = vld [vmem:[#allocation11 + $0x74] ss:$24 sps:$4 sm:$0xff]   ;;  %v1305_v8 = vld [vmem:[#allocation11 + $0x70] ss:$24 sps:$4 sm:$0xff]   ;;  %v1308_v10 = vld [vmem:[#allocation11 + $0xa0] ss:$24 sps:$4 sm:$0xff]  }
  0x85   :  { %1188 = vmatprep.subr.bf16.mxu0 %v1545_v0  ;;  %1208 = vmatprep.subr.bf16.mxu1 %v1545_v0  ;;  %v1311_v12 = vld [vmem:[#allocation11 + $0xd0] ss:$24 sps:$4 sm:$0xff]  }
  0x88   :  { %1189 = vmatpush3.bf16.msra.mxu0 %v1240_v9  ;;  %1209 = vmatpush3.bf16.msra.mxu1 %v1248_v14  ;;  %v1310_v9 = vld [vmem:[#allocation11 + $0xa4] ss:$24 sps:$4 sm:$0xff]   ;;  %v1314_v14 = vld [vmem:[#allocation11 + $0x100] ss:$24 sps:$4 sm:$0xff]  }
  0x89   :  { %1190 = vmatprep.subr.bf16.mxu0 %v1545_v0  ;;  %1210 = vmatprep.subr.bf16.mxu1 %v1545_v0 }
  0x8c   :  { %1191 = vmatpush3.bf16.msra.mxu0 %v1241_v11  ;;  %1211 = vmatpush3.bf16.msra.mxu1 %v1249_v16  ;;  %v1313_v11 = vld [vmem:[#allocation11 + $0xd4] ss:$24 sps:$4 sm:$0xff]   ;;  %v1317_v16 = vld [vmem:[#allocation11 + $0x130] ss:$24 sps:$4 sm:$0xff]  }
  0x8d   :  { %1192 = vmatprep.subr.bf16.mxu0 %v1545_v0  ;;  %1212 = vmatprep.subr.bf16.mxu1 %v1545_v0 }
  0x90   :  { %1193 = vmatpush3.bf16.msra.mxu0 %v1242_v13  ;;  %1213 = vmatpush3.bf16.msra.mxu1 %v1250_v17  ;;  %v1316_v13 = vld [vmem:[#allocation11 + $0x104] ss:$24 sps:$4 sm:$0xff]  }
  0x91   :  { %663 = vmatprep.subr.bf16.mxu0 %v1253_v19  ;;  %704 = vmatprep.subr.bf16.mxu1 %v1256_v20  ;;  %v1322_v17 = vld [vmem:[#allocation11 + $0x164] ss:$24 sps:$4 sm:$0xff]   ;;  %v393_v19 = vlaneseq }
  0x93   :  { %1195 = vmatmul.mubr.bf16.vlgmr.msra.gmra.mrb[0].mxu0 %v116_v15  ;;  %v1319_v15 = vld [vmem:[#allocation11 + $0x134] ss:$24 sps:$4 sm:$0xff]   ;;  %v1685_v20 = vshrl.u32 %v393_v19, 7  ;;  %vm1053_vm2 = vcmp.lt.s32.totalorder %v393_v19, 768 }
  0x94   :  { %664 = vmatpush1.bf16.msra.mxu0 %v1251_v18  ;;  %695 = vmatprep.mubr.bf16.mxu0 %v1547_v59  ;;  %v1320_v18 = vld [vmem:[#allocation11 + $0x160] ss:$24 sps:$4 sm:$0xff]  }
  0x95   :  { %665 = vmatprep.subr.bf16.mxu0 %v1259_v21  ;;  %v1548_v21 = vmov 1983009808  }
  0x98   :  { %666 = vmatpush1.bf16.msra.mxu0 %v1257_v22  ;;  %v854_v22 = vunpack.c.l.s4 %v1548_v21  ;;  %v1549_v21 = vmov 1966171168  }
  0x99   :  { %667 = vmatprep.subr.bf16.mxu0 %v1265_v23  ;;  %v1690_v23 = vld [vmem:[%s1795_s9] sm:$0x3f] }
  0x9c   :  { %668 = vmatpush1.bf16.msra.mxu0 %v1263_v24  ;;  %v395_v24 = vsub.s32 0, %v1685_v20 }
  0x9d   :  { %669 = vmatprep.subr.bf16.mxu0 %v1271_v25  ;;  %v403_v25 = vsub.s32 2, %v1685_v20 }
  0xa0   :  { %670 = vmatpush1.bf16.msra.mxu0 %v1269_v26  ;;  %v399_v26 = vsub.s32 1, %v1685_v20 }
  0xa1   :  { %671 = vmatprep.subr.bf16.mxu0 %v1277_v27  ;;  %v1698_v27 = vld [vmem:[%s1792_s6] sm:$0x3f] }
  0xa4   :  { %672 = vmatpush1.bf16.msra.mxu0 %v1275_v28  ;;  %v407_v28 = vsub.s32 3, %v1685_v20 }
  0xa5   :  { %673 = vmatprep.subr.bf16.mxu0 %v1283_v29  ;;  %v830_v29 = vrot.slane %v1690_v23, %v395_v24 }
  0xa8   :  { %674 = vmatpush1.bf16.msra.mxu0 %v1281_v30  ;;  %v834_v30 = vrot.slane %v1690_v23, %v399_v26 }
  0xa9   :  { %675 = vmatprep.subr.bf16.mxu0 %v1289_v31  ;;  %v855_v31 = vunpack.c.0.s8 %v854_v22  ;;  %v1014_v22 = vunpack.c.l.s4 %v1549_v21 }
  0xac   :  { %676 = vmatpush1.bf16.msra.mxu0 %v1287_v32  ;;  %v1706_v32 = vld [vmem:[%s1794_s8] sm:$0x3f] }
  0xad   :  { %677 = vmatprep.subr.bf16.mxu0 %v1295_v54 }
  0xb0   :  { %678 = vmatpush1.bf16.msra.mxu0 %v1293_v55 }
  0xb1   :  { %745 = vmatprep.subr.bf16.mxu0 %v1301_v58 }
 0x166   :  { %v222_v34 = vpop.f32.mrb[0].mxu0 }
 0x167   :  { %v223_v35 = vadd.f32 %v1088_v33, %v222_v34  ;;  %v1196_v36 = vpop.f32.mrb[1].mxu0  ;;  %v838_v33 = vrot.slane %v1690_v23, %v403_v25  ;;  %v842_v34 = vrot.slane %v1690_v23, %v407_v28 }
 0x168   :  { %v225_v37 = vpop.f32.mrb[2].mxu0  ;;  %v404_v36 = vrot.slane %v1698_v27, %v403_v25 }
 0x169   :  { %v228_v38 = vmax.f32 %v223_v35, 0.0  ;;  %v1197_v39 = vpop.f32.mrb[3].mxu0  ;;  %v396_v35 = vrot.slane %v1698_v27, %v395_v24  ;;  %v400_v37 = vrot.slane %v1698_v27, %v399_v26 }
 0x16a   :  { %v885_v39 = vrot.slane %v1706_v32, %v395_v24 }
 0x16b   :  { %v229_v41 = vpack.c.bf16 %v228_v38, %v228_v38  ;;  %v408_v38 = vrot.slane %v1698_v27, %v407_v28 }
 0x16d   :  { %1215 = vmatmul.mubr.bf16.vlgmr.msra.gmra.mrb[0].mxu1 %v229_v41  ;;  %v1716_v41 = vsub.s32 %v855_v31, %v1685_v20 }
 0x16e   :  { %705 = vmatpush1.bf16.msra.mxu1 %v1254_v40  ;;  %736 = vmatprep.mubr.bf16.mxu1 %v1547_v59  ;;  %v851_v40 = vcombine.low %v830_v29, %v834_v30  ;;  %v415_v29 = vsub.s32 5, %v1685_v20 }
 0x16f   :  { %706 = vmatprep.subr.bf16.mxu1 %v1262_v42  ;;  %v889_v42 = vrot.slane %v1706_v32, %v399_v26  ;;  %v411_v26 = vsub.s32 4, %v1685_v20 }
 0x170   :  { %v859_v58 = vrot.slane %v851_v40, %v1716_v41 }
 0x172   :  { %707 = vmatpush1.bf16.msra.mxu1 %v1260_v43 }
 0x173   :  { %708 = vmatprep.subr.bf16.mxu1 %v1268_v44 }
 0x176   :  { %709 = vmatpush1.bf16.msra.mxu1 %v1266_v45  ;;  %v893_v45 = vrot.slane %v1706_v32, %v403_v25 }
 0x177   :  { %710 = vmatprep.subr.bf16.mxu1 %v1274_v46  ;;  %v852_v46 = vcombine.low %v838_v33, %v842_v34 }
 0x17a   :  { %711 = vmatpush1.bf16.msra.mxu1 %v1272_v47  ;;  %v897_v47 = vrot.slane %v1706_v32, %v407_v28  ;;  %v1015_v28 = vunpack.c.0.s8 %v1014_v22 }
 0x17b   :  { %712 = vmatprep.subr.bf16.mxu1 %v1280_v48 }
 0x17e   :  { %713 = vmatpush1.bf16.msra.mxu1 %v1278_v49 }
 0x17f   :  { %714 = vmatprep.subr.bf16.mxu1 %v1286_v50 }
 0x182   :  { %715 = vmatpush1.bf16.msra.mxu1 %v1284_v51 }
 0x183   :  { %716 = vmatprep.subr.bf16.mxu1 %v1292_v52 }
 0x186   :  { %717 = vmatpush1.bf16.msra.mxu1 %v1290_v53 }
 0x187   :  { %718 = vmatprep.subr.bf16.mxu1 %v1298_v56 }
 0x18a   :  { %719 = vmatpush1.bf16.msra.mxu1 %v1296_v57 }
 0x240   :  { %v335_v61 = vpop.f32.mrb[0].mxu1 }
 0x241   :  { %v336_v62 = vadd.f32 %v1097_v60, %v335_v61  ;;  %v1216_v63 = vpop.f32.mrb[1].mxu1 }
 0x242   :  { %v338_v0 = vpop.f32.mrb[2].mxu1 }
 0x243   :  { %v341_v1 = vmax.f32 %v336_v62, 0.0  ;;  %v1217_v2 = vpop.f32.mrb[3].mxu1  ;;  %v866_v0 = vrot.slane %v852_v46, %v1716_v41 }
 0x244   :  { %v1726_v2 = vld [vmem:[%s1793_s7] sm:$0x3f]  ;;  %s1550_s7 = smov [#allocation14]  }
 0x245   :  { %v342_v4 = vpack.c.bf16 %v341_v1, %v341_v1  ;;  %v907_v1 = vcombine.low %v893_v45, %v897_v47  ;;  %s1072_s3 = sshll.u32 %s1550_s7, 4  ;;  %s1073_s3 = int_to_ptr.vmem [resolvable:$true] %s1072_s3 }
 0x246   :  { %s1479_s27 = scalar_lea.vmem %s1073_s3, 96  ;;  %p1484_p7 = scmp.lt.s32.totalorder %s1073_s3, %s1073_s3 }
 0x247   :  { %696 = vmatmul.mubr.bf16.vlgmr.msra.gmra.mrb[4].mxu0 %v342_v4  ;;  %737 = vmatmul.mubr.bf16.vlgmr.msra.gmra.mrb[4].mxu1 %v342_v4  ;;  %p1480_p6 = scmp.ne.s32.totalorder %s1073_s3, %s1479_s27  ;;  %p1485_p8 = scmp.lt.s32.totalorder %s1479_s27, %s1479_s27 }
 0x248   :  { %746 = vmatpush1.bf16.msra.mxu0 %v1299_v3  ;;  %777 = vmatprep.mubr.bf16.mxu0 %v1547_v59  ;;  %v906_v59 = vcombine.low %v885_v39, %v889_v42  ;;  %v416_v39 = vrot.slane %v1698_v27, %v415_v29 }
 0x249   :  { %747 = vmatprep.subr.bf16.mxu0 %v1304_v5  ;;  %v921_v5 = vrot.slane %v907_v1, %v1716_v41  ;;  %p1486_p9 = por %p1485_p8, %p1484_p7 }
 0x24a   :  { %v914_v3 = vrot.slane %v906_v59, %v1716_v41 }
 0x24b   :  { %p1487_p10 = pnand %p1486_p9, %p1480_p6 }
 0x24c   :  { %748 = vmatpush1.bf16.msra.mxu0 %v1302_v6  ;;  %v823_v6 = vunpack.c.l.bf16 %v1726_v2 }
 0x24d   :  { %749 = vmatprep.subr.bf16.mxu0 %v1307_v7 }
 0x250   :  { %750 = vmatpush1.bf16.msra.mxu0 %v1305_v8  ;;  %v922_v8 = vcombine.low %v914_v3, %v921_v5  ;;  %v901_v3 = vrot.slane %v1706_v32, %v411_v26 }
 0x251   :  { %751 = vmatprep.subr.bf16.mxu0 %v1310_v9 }
 0x254   :  { %752 = vmatpush1.bf16.msra.mxu0 %v1308_v10 }
 0x255   :  { %753 = vmatprep.subr.bf16.mxu0 %v1313_v11 }
 0x258   :  { %754 = vmatpush1.bf16.msra.mxu0 %v1311_v12 }
 0x259   :  { %755 = vmatprep.subr.bf16.mxu0 %v1316_v13 }
 0x25c   :  { %756 = vmatpush1.bf16.msra.mxu0 %v1314_v14 }
 0x25d   :  { %757 = vmatprep.subr.bf16.mxu0 %v1319_v15 }
 0x260   :  { %758 = vmatpush1.bf16.msra.mxu0 %v1317_v16 }
 0x261   :  { %759 = vmatprep.subr.bf16.mxu0 %v1322_v17 }
 0x264   :  { %760 = vmatpush1.bf16.msra.mxu0 %v1320_v18 }
 0x267   :  { %778 = vmatmul.mubr.bf16.vlgmr.msra.gmra.mrb[8].mxu0 %v342_v4  ;;  %v867_v4 = vcombine.low %v859_v58, %v866_v0 }
 0x269   :  { %v878_v7 = vmul.f32 %v867_v4, %v823_v6 }
 0x26b   :  { %v933_v12 = vadd.f32 %v922_v8, %v878_v7 }
 0x26d   :  { %v937_v18 = vcombine.high %v933_v12, %v933_v12  ;;  %v944_v24 = vrot.slane %v933_v12, %v1716_v41 }
 0x26f   :  { %v951_v25 = vrot.slane %v937_v18, %v1716_v41  ;;  %v952_v30 = vcombine.high %v944_v24, %v944_v24 }
 0x271   :  { %v953_v33 = vcombine.high %v951_v25, %v951_v25 }
 0x31a   :  { %v697_v43 = vpop.f32.mrb[4].mxu0  ;;  %v738_v44 = vpop.f32.mrb[4].mxu1 }
 0x31b   :  { %v698_v48 = vadd.f32 %v697_v43, %v396_v35  ;;  %v739_v49 = vadd.f32 %v738_v44, %v404_v36  ;;  %v699_v50 = vpop.f32.mrb[5].mxu0  ;;  %v740_v51 = vpop.f32.mrb[5].mxu1  ;;  %v412_v35 = vrot.slane %v1698_v27, %v411_v26 }
 0x31c   :  { %v700_v52 = vadd.f32 %v699_v50, %v400_v37  ;;  %v741_v53 = vadd.f32 %v740_v51, %v408_v38  ;;  %v701_v54 = vpop.f32.mrb[6].mxu0  ;;  %v742_v55 = vpop.f32.mrb[6].mxu1  ;;  %v1737_v37 = vsub.s32 %v1015_v28, %v1685_v20 }
 0x31d   :  { %v1154_v56 = vmul.f32 -1.442695, %v698_v48  ;;  %v1156_v57 = vmul.f32 -1.442695, %v739_v49  ;;  %v702_v60 = vpop.f32.mrb[7].mxu0  ;;  %v743_v61 = vpop.f32.mrb[7].mxu1  ;;  %v846_v55 = vrot.slane %v1690_v23, %v411_v26 }
 0x31e   :  { %v1155_v62 = vmul.f32 -1.442695, %v700_v52  ;;  %v1157_v63 = vmul.f32 -1.442695, %v741_v53 }
 0x31f   :  { %1323 = vpow2.f32 %v1154_v56  ;;  %v850_v56 = vrot.slane %v1690_v23, %v415_v29  ;;  %v905_v23 = vrot.slane %v1706_v32, %v415_v29 }
 0x320   :  { %1325 = vpow2.f32 %v1156_v57 }
 0x321   :  { %1327 = vpow2.f32 %v1155_v62  ;;  %v868_v5 = vcombine.low %v846_v55, %v850_v56 }
 0x322   :  { %1329 = vpow2.f32 %v1157_v63 }
 0x329   :  { %v1324_v9 = vpop.eup %1323 }
 0x32a   :  { %v1326_v10 = vpop.eup %1325  ;;  %v804_v11 = vadd.f32 1.0, %v1324_v9  ;;  %v824_v9 = vunpack.c.h.bf16 %v1726_v2 }
 0x32b   :  { %v1328_v13 = vpop.eup %1327  ;;  %v806_v14 = vadd.f32 1.0, %v1326_v10  ;;  %v875_v10 = vrot.slane %v868_v5, %v1716_v41 }
 0x32c   :  { %v1330_v15 = vpop.eup %1329  ;;  %1331 = vrcp.f32 %v804_v11  ;;  %v805_v16 = vadd.f32 1.0, %v1328_v13  ;;  %v923_v11 = vcombine.low %v901_v3, %v905_v23 }
 0x32d   :  { %1333 = vrcp.f32 %v806_v14  ;;  %v807_v17 = vadd.f32 1.0, %v1330_v15  ;;  %v879_v12 = vmul.f32 %v875_v10, %v824_v9 }
 0x32e   :  { %1335 = vrcp.f32 %v805_v16  ;;  %v930_v13 = vrot.slane %v923_v11, %v1716_v41 }
 0x32f   :  { %1337 = vrcp.f32 %v807_v17 }
 0x330   :  { %v934_v18 = vadd.f32 %v930_v13, %v879_v12 }
 0x332   :  { %v960_v32 = vrot.slane %v934_v18, %v1716_v41 }
 0x334   :  { %v961_v21 = vcombine.high %v960_v32, %v960_v32 }
 0x336   :  { %v1332_v31 = vpop.eup %1331 }
 0x337   :  { %v1334_v34 = vpop.eup %1333  ;;  %v968_v36 = vsub.f32 %v1332_v31, %v944_v24 }
 0x338   :  { %v1336_v38 = vpop.eup %1335  ;;  %v970_v40 = vsub.f32 %v1334_v34, %v951_v25 }
 0x339   :  { %v1338_v42 = vpop.eup %1337  ;;  %v969_v43 = vsub.f32 %v1336_v38, %v952_v30  ;;  %v974_v44 = vmul.f32 %v968_v36, %v968_v36  ;;  %v1010_v45 = vcombine.low %v1332_v31, %v1336_v38 }
 0x33a   :  { %v779_v46 = vpop.f32.mrb[8].mxu0  ;;  %v971_v47 = vsub.f32 %v1338_v42, %v953_v33  ;;  %v976_v48 = vmul.f32 %v970_v40, %v970_v40  ;;  %v1011_v49 = vcombine.low %v1334_v34, %v1338_v42 }
 0x33b   :  { %v780_v50 = vadd.f32 %v779_v46, %v412_v35  ;;  %v781_v51 = vpop.f32.mrb[9].mxu0  ;;  %v975_v52 = vmul.f32 %v969_v43, %v969_v43  ;;  %v981_v53 = vsel %vm980_vm1, %v974_v44, 0.0  ;;  %v1019_v54 = vrot.slane %v1010_v45, %v1737_v37 }
 0x33c   :  { %v782_v27 = vadd.f32 %v781_v51, %v416_v39  ;;  %v783_v57 = vpop.f32.mrb[10].mxu0  ;;  %v1026_v58 = vrot.slane %v1011_v49, %v1737_v37  ;;  %v977_v61 = vmul.f32 %v971_v47, %v971_v47  ;;  %v984_v4 = vsel %vm980_vm1, %v976_v48, 0.0 }
 0x33d   :  { %v1158_v59 = vmul.f32 -1.442695, %v780_v50  ;;  %v784_v60 = vpop.f32.mrb[11].mxu0  ;;  %v982_v62 = vsel %vm980_vm1, %v975_v52, 0.0 }
 0x33e   :  { %v1159_v63 = vmul.f32 -1.442695, %v782_v27  ;;  %v983_v0 = vadd.f32 %v982_v62, %v981_v53  ;;  %v1034_v1 = vcombine.low %v1019_v54, %v1026_v58  ;;  %v986_v7 = vsel %vm980_vm1, %v977_v61, 0.0 }
 0x33f   :  { %1339 = vpow2.f32 %v1158_v59 }
 0x340   :  { %1341 = vpow2.f32 %v1159_v63  ;;  %v985_v6 = vadd.f32 %v984_v4, %v983_v0  ;;  %v1041_v35 = vrot.slane %v1034_v1, %v1737_v37 }
 0x342   :  { %v987_v8 = vadd.f32 %v986_v7, %v985_v6 }
 0x349   :  { %v1340_v14 = vpop.eup %1339 }
 0x34a   :  { %v1342_v15 = vpop.eup %1341  ;;  %v808_v16 = vadd.f32 1.0, %v1340_v14 }
 0x34b   :  { %v809_v17 = vadd.f32 1.0, %v1342_v15 }
 0x34c   :  { %1343 = vrcp.f32 %v808_v16 }
 0x34d   :  { %1345 = vrcp.f32 %v809_v17 }
 0x356   :  { %v1344_v22 = vpop.eup %1343 }
 0x357   :  { %v1346_v24 = vpop.eup %1345  ;;  %v972_v25 = vsub.f32 %v1344_v22, %v960_v32 }
 0x358   :  { %v973_v2 = vsub.f32 %v1346_v24, %v961_v21  ;;  %v1012_v26 = vcombine.low %v1344_v22, %v1346_v24 }
 0x359   :  { %v978_v28 = vmul.f32 %v972_v25, %v972_v25 }
 0x35a   :  { %v979_v29 = vmul.f32 %v973_v2, %v973_v2  ;;  %v1033_v30 = vrot.slane %v1012_v26, %v1737_v37 }
 0x35b   :  { %v988_v31 = vsel %vm980_vm1, %v978_v28, 0.0 }
 0x35c   :  { %v989_v33 = vadd.f32 %v988_v31, %v987_v8  ;;  %v990_v34 = vsel %vm980_vm1, %v979_v29, 0.0  ;;  %v1048_v36 = vrot.slane %v1033_v30, %v1737_v37 }
 0x35e   :  { %v991_v41 = vadd.f32 %v990_v34, %v989_v33  ;;  %v1049_v38 = vcombine.low %v1041_v35, %v1048_v36 }
 0x360   :  { %992 = vadd.xlane.f32.xlu0 %v991_v41  ;;  %1055 = vst.msk [vmem:[#allocation14] sm:$0x3f] %vm1053_vm2, %v1049_v38 }
 0x361   :  { %1490 = shalt.err (!%p1487_p10)
}
 0x362   :  { %s1491_s2 = scalar_lea.hbm %s1797_s11, 96 }
 0x363   :  { %p1492_p11 = scmp.ne.s32.totalorder %s1797_s11, %s1491_s2  ;;  %p1495_p12 = scmp.lt.u32.totalorder %s1491_s2, %s1797_s11 }
 0x365   :  { %p1497_p13 = pnand %p1495_p12, %p1492_p11 }
 0x367   :  { %1500 = shalt.err (!%p1497_p13)
}
 0x368   :  { %1075 = dma.vmem_to_hbm [thread:$0]  %s1073_s3, 96, %s1797_s11, [#allocation15]   ;;  %v996_v37 = vand.u32 127, %v393_v19  ;;  %vm1002_vm3 = vcmask 8192  }
 0x369   :  { %s1551_s25 = smov [#allocation13]  }
 0x36a   :  { %v999_v39 = vsub.s32 %v996_v37, %v1685_v20  ;;  %s1062_s26 = sshll.u32 %s1551_s25, 4  ;;  %s1063_s26 = int_to_ptr.vmem [resolvable:$true] %s1062_s26 }
 0x36b   :  { %s1501_s0 = scalar_lea.vmem %s1063_s26, 16  ;;  %s1505_s15 = scalar_lea.vmem %s1063_s26, 32 }
 0x36c   :  { %p1502_p0 = scmp.ne.s32.totalorder %s1063_s26, %s1501_s0  ;;  %p1506_p1 = scmp.lt.s32.totalorder %s1063_s26, %s1063_s26 }
 0x36d   :  { %p1507_p2 = scmp.lt.s32.totalorder %s1505_s15, %s1501_s0 }
 0x36f   :  { %p1508_p3 = por %p1507_p2, %p1506_p1 }
 0x371   :  { %p1509_p4 = pnand %p1508_p3, %p1502_p0 }
 0x3ed   :  { %v993_v40 = vpop.xlane.xlu0 %992 }
 0x3ee   :  { %v1000_v42 = vrot.slane %v993_v40, %v999_v39 }
 0x3f0   :  { %1003 = vst.msk [vmem:[#allocation13] sm:$0x1] %vm1002_vm3, %v1000_v42 }
 0x3f1   :  { %1512 = shalt.err (!%p1509_p4)
}
 0x3f2   :  { %s1513_s4 = scalar_lea.hbm %s1796_s10, 16 }
 0x3f3   :  { %p1514_p5 = scmp.ne.s32.totalorder %s1796_s10, %s1513_s4  ;;  %p1517_p6 = scmp.lt.u32.totalorder %s1513_s4, %s1796_s10 }
 0x3f5   :  { %p1519_p7 = pnand %p1517_p6, %p1514_p5 }
 0x3f7   :  { %1522 = shalt.err (!%p1519_p7)
}
 0x3f8   :  { %1065 = dma.vmem_to_hbm [thread:$0]  %s1063_s26, 16, %s1796_s10, [#allocation4]  }
 0x3f9   :  { %1531 = dma.done.wait [#allocation4], 16  }
 0x3fa   :  { %1532 = vsyncadd [#allocation4], 4294967280 }
 0x3fb   :  { %1533 = dma.done.wait [#allocation15], 96  }
 0x3fc   :  { %1534 = vsyncadd [#allocation15], 4294967200 }
 0x3fd   :  { %1082 = vsyncpa [#allocation3], 1 }
 0x3fe   :  { %1083 = vsyncpa [#allocation6], 1 }
 0x3ff   :  { %1084 = vsyncpa [#allocation9], 1 }
 0x400   :  { %1085 = vsyncpa [#allocation12], 1 }
 0x401   :  { %1086 = vsyncpa [#allocation4], 1 }
 0x402   :  { %1087 = vsyncpa [#allocation15], 1 }

</bundles_post_ra>
